<compile_context>
chip_gen: v5e
topology: v5e:2x2
jax: 0.10.0
libtpu: 0.0.40
codegen_flags: <defaults>
</compile_context>

<pallas_src>
import functools

import jax
import jax.numpy as jnp
from jax.experimental import pallas as pl
from jax.experimental.pallas import tpu as pltpu


def _sem_head_kernel(x_ref, w_ref, b_ref, o_ref, acc_ref, *, inv_hw, inv_t):
    # x_ref: [tn, thw, C]  w_ref: [C, Kp]  b_ref: [1, Kp]  o_ref: [tn, Kp]
    # acc_ref: [tn, C] f32 scratch, persistent across the HW (reduction) axis.
    k = pl.program_id(1)

    @pl.when(k == 0)
    def _():
        acc_ref[...] = jnp.zeros_like(acc_ref)

    # Partial spatial sum for this HW tile. Reduce over the sublane (HW) axis,
    # keep channels lane-dense; accumulate in f32 regardless of input dtype.
    acc_ref[...] += jnp.sum(x_ref[...].astype(jnp.float32), axis=1)

    @pl.when(k == pl.num_programs(1) - 1)
    def _():
        # Fold the mean (1/HW) and temperature (1/T) into one scale on the
        # pooled accumulator; bias only needs the 1/T factor.
        pooled = acc_ref[...] * (inv_hw * inv_t)                      # [tn, C]
        score = jnp.dot(pooled, w_ref[...].astype(jnp.float32),
                        preferred_element_type=jnp.float32)           # [tn, Kp]
        score = score + b_ref[...].astype(jnp.float32) * inv_t
        o_ref[...] = score.astype(o_ref.dtype)


def _pick_tile(total, target, align):
    """Largest t <= min(total, target) with total % t == 0 and t % align == 0.
    Falls back to the full extent (a full-dim block always satisfies the TPU
    (8,128) tiling rule)."""
    cap = min(total, target)
    for t in range(cap, 0, -1):
        if total % t == 0 and t % align == 0:
            return t
    return total


def sem_head_forward(x_nchw, weight, bias, T=1.0, *, hw_block=None, n_block=None):
    """x_nchw: [N, C, H, W]; weight: [K, C] (torch Linear layout); bias: [K]."""
    N, C, H, W = x_nchw.shape
    K = weight.shape[0]
    HW = H * W

    # ---- layout plumbing (outside the kernel) --------------------------------
    # Channels-last so the in-kernel pooling reduces over sublanes, not lanes.
    x = jnp.transpose(x_nchw, (0, 2, 3, 1)).reshape(N, HW, C)       # [N, HW, C]
    # Pad the cluster dimension to a lane-dense multiple of 128.
    Kp = max(128, ((K + 127) // 128) * 128)
    w = jnp.zeros((C, Kp), jnp.float32).at[:, :K].set(weight.T.astype(jnp.float32))
    b = jnp.zeros((1, Kp), jnp.float32).at[:, :K].set(bias.astype(jnp.float32))

    # ---- tile selection ------------------------------------------------------
    thw = hw_block if hw_block is not None else _pick_tile(HW, 512, 8)
    if HW % thw != 0 or (thw % 8 != 0 and thw != HW):
        thw = HW                                   # full-dim fallback is always legal
    tn = n_block if n_block is not None else _pick_tile(N, 128, 8)
    if N % tn != 0 or (tn % 8 != 0 and tn != N):
        tn = N

    grid = (N // tn, HW // thw)

    # ---- VMEM budget (double-buffered inputs + output + accumulator) --------
    itemsize = jnp.dtype(x.dtype).itemsize
    vmem_need = (2 * tn * thw * C * itemsize      # x tiles (double-buffered)
                 + 2 * C * Kp * 4 + 2 * Kp * 4    # w, b
                 + 2 * tn * Kp * 4                # output tile
                 + tn * C * 4)                    # f32 accumulator scratch
    vmem_limit = int(min(48 * 1024 * 1024, max(4 * vmem_need, 16 * 1024 * 1024)))

    kernel = functools.partial(
        _sem_head_kernel, inv_hw=1.0 / float(HW), inv_t=1.0 / float(T)
    )

    cost = pl.CostEstimate(
        flops=N * HW * C + 2 * N * C * Kp + 2 * N * Kp,
        transcendentals=0,
        bytes_accessed=(x.size * itemsize + w.size * 4 + b.size * 4 + N * Kp * 4),
    )

    out = pl.pallas_call(
        kernel,
        out_shape=jax.ShapeDtypeStruct((N, Kp), jnp.float32),
        grid_spec=pltpu.PrefetchScalarGridSpec(
            num_scalar_prefetch=0,
            grid=grid,
            in_specs=[
                pl.BlockSpec((tn, thw, C), lambda i, k: (i, k, 0)),
                pl.BlockSpec((C, Kp), lambda i, k: (0, 0)),
                pl.BlockSpec((1, Kp), lambda i, k: (0, 0)),
            ],
            out_specs=pl.BlockSpec((tn, Kp), lambda i, k: (i, 0)),
            scratch_shapes=[pltpu.VMEM((tn, C), jnp.float32)],
        ),
        compiler_params=pltpu.CompilerParams(
            dimension_semantics=("parallel", "arbitrary"),
            vmem_limit_bytes=vmem_limit,
        ),
        cost_estimate=cost,
    )(x, w, b)

    return out[:, :K]


def sem_head_reference(x_nchw, weight, bias, T=1.0):
    pooled = jnp.mean(x_nchw.astype(jnp.float32), axis=(2, 3))       # [N, C]
    score = pooled @ weight.T.astype(jnp.float32) + bias.astype(jnp.float32)
    return score / T


if __name__ == "__main__":
    key = jax.random.PRNGKey(0)
    kx, kw, kb = jax.random.split(key, 3)

    # Small shapes consistent with the module: batch=2, channels=4,
    # spatial=16x16, num_cluster=10, temperature T=1.
    N, C, H, W = 2, 4, 16, 16
    num_cluster = 10
    T = 1.0

    x = jax.random.normal(kx, (N, C, H, W), dtype=jnp.float32)
    # Deterministic synthetic parameters for classifier = Linear(C, num_cluster).
    weight = jax.random.normal(kw, (num_cluster, C), dtype=jnp.float32) * 0.1
    bias = jax.random.normal(kb, (num_cluster,), dtype=jnp.float32) * 0.01

    # hw_block=128 forces 2 reduction steps on the HW grid axis so the
    # accumulator init/finalize path is exercised even at this toy size.
    out = sem_head_forward(x, weight, bias, T=T, hw_block=128)
    out = jax.block_until_ready(out)

    ref = sem_head_reference(x, weight, bias, T=T)
    assert out.shape == (N, num_cluster)
    assert jnp.allclose(out, ref, atol=1e-5, rtol=1e-5), "mismatch vs reference"

    # TODO(synk): feature_conv branch (feature_conv=None in this config) and the
    # training-only loss()/select_samples() paths are not part of forward().
    print("KERNEL_OK")
</pallas_src>

<mosaic_0001>
module attributes {stable_mosaic.version = 11 : i64} {
  func.func @_sem_head_kernel(%arg0: i32, %arg1: i32, %arg2: memref<2x128x4xf32, #tpu.memory_space<vmem>>, %arg3: memref<4x128xf32, #tpu.memory_space<vmem>>, %arg4: memref<1x128xf32, #tpu.memory_space<vmem>>, %arg5: memref<2x128xf32, #tpu.memory_space<vmem>>, %arg6: memref<2x4xf32, #tpu.memory_space<vmem>>) attributes {dimension_semantics = [#tpu.dimension_semantics<parallel>, #tpu.dimension_semantics<arbitrary>], iteration_bounds = array<i64: 1, 2>, scalar_prefetch = 0 : i64, scratch_operands = 1 : i64, tpu.core_type = #tpu.core_type<tc>, window_params = [{transform_indices = @transform_0, window_bounds = array<i64: 2, 128, 4>}, {pipeline_mode = #tpu.pipeline_mode<synchronous>, transform_indices = @transform_1, window_bounds = array<i64: 4, 128>}, {pipeline_mode = #tpu.pipeline_mode<synchronous>, transform_indices = @transform_2, window_bounds = array<i64: 1, 128>}, {transform_indices = @transform_3, window_bounds = array<i64: 2, 128>}]} {
    %c0_i32 = arith.constant 0 : i32
    %0 = arith.cmpi eq, %arg1, %c0_i32 : i32
    %1 = arith.extui %0 : i1 to i32
    %c0_i32_0 = arith.constant 0 : i32
    %2 = arith.cmpi ne, %1, %c0_i32_0 : i32
    scf.if %2 {
      %cst_8 = arith.constant 0.000000e+00 : f32
      %11 = vector.broadcast %cst_8 : f32 to vector<2x4xf32>
      %c0_9 = arith.constant 0 : index
      %c0_10 = arith.constant 0 : index
      %12 = vector.load %arg6[%c0_9, %c0_10] : memref<2x4xf32, #tpu.memory_space<vmem>>, vector<2x4xf32>
      tpu.vector_store %arg6[%c0_9, %c0_10], %11 {strides = array<i32>} : memref<2x4xf32, #tpu.memory_space<vmem>>, vector<2x4xf32>,
    } else {
    }
    %c0 = arith.constant 0 : index
    %c0_1 = arith.constant 0 : index
    %3 = vector.load %arg6[%c0, %c0_1] : memref<2x4xf32, #tpu.memory_space<vmem>>, vector<2x4xf32>
    %c0_2 = arith.constant 0 : index
    %c0_3 = arith.constant 0 : index
    %c0_4 = arith.constant 0 : index
    %4 = vector.load %arg2[%c0_2, %c0_3, %c0_4] : memref<2x128x4xf32, #tpu.memory_space<vmem>>, vector<2x128x4xf32>
    %cst = arith.constant dense<0.000000e+00> : vector<2x4xf32>
    %5 = vector.multi_reduction <add>, %4, %cst [1] : vector<2x128x4xf32> to vector<2x4xf32>
    %6 = arith.addf %3, %5 : vector<2x4xf32>
    %c0_5 = arith.constant 0 : index
    %c0_6 = arith.constant 0 : index
    %7 = vector.load %arg6[%c0_5, %c0_6] : memref<2x4xf32, #tpu.memory_space<vmem>>, vector<2x4xf32>
    tpu.vector_store %arg6[%c0_5, %c0_6], %6 {strides = array<i32>} : memref<2x4xf32, #tpu.memory_space<vmem>>, vector<2x4xf32>,
    %c1_i32 = arith.constant 1 : i32
    %8 = arith.cmpi eq, %arg1, %c1_i32 : i32
    %9 = arith.extui %8 : i1 to i32
    %c0_i32_7 = arith.constant 0 : i32
    %10 = arith.cmpi ne, %9, %c0_i32_7 : i32
    scf.if %10 {
      %c0_8 = arith.constant 0 : index
      %c0_9 = arith.constant 0 : index
      %11 = vector.load %arg6[%c0_8, %c0_9] : memref<2x4xf32, #tpu.memory_space<vmem>>, vector<2x4xf32>
      %cst_10 = arith.constant 3.906250e-03 : f32
      %12 = vector.broadcast %cst_10 : f32 to vector<2x4xf32>
      %13 = arith.mulf %11, %12 : vector<2x4xf32>
      %c0_11 = arith.constant 0 : index
      %c0_12 = arith.constant 0 : index
      %14 = vector.load %arg3[%c0_11, %c0_12] : memref<4x128xf32, #tpu.memory_space<vmem>>, vector<4x128xf32>
      %cst_13 = arith.constant dense<0.000000e+00> : vector<2x128xf32>
      %15 = tpu.matmul %13, %14, %cst_13 {dimension_numbers = #tpu.dot_dimension_numbers<[1], [0], [0], [1], [0, 0, 1, 1], [], []>} : vector<2x4xf32>, vector<4x128xf32>, vector<2x128xf32> -> vector<2x128xf32>
      %c0_14 = arith.constant 0 : index
      %c0_15 = arith.constant 0 : index
      %16 = vector.load %arg4[%c0_14, %c0_15] : memref<1x128xf32, #tpu.memory_space<vmem>>, vector<1x128xf32>
      %cst_16 = arith.constant 1.000000e+00 : f32
      %17 = vector.broadcast %cst_16 : f32 to vector<1x128xf32>
      %18 = arith.mulf %16, %17 : vector<1x128xf32>
      %19 = vector.broadcast %18 : vector<1x128xf32> to vector<2x128xf32>
      %20 = arith.addf %15, %19 : vector<2x128xf32>
      %c0_17 = arith.constant 0 : index
      %c0_18 = arith.constant 0 : index
      %21 = vector.load %arg5[%c0_17, %c0_18] : memref<2x128xf32, #tpu.memory_space<vmem>>, vector<2x128xf32>
      tpu.vector_store %arg5[%c0_17, %c0_18], %20 {strides = array<i32>} : memref<2x128xf32, #tpu.memory_space<vmem>>, vector<2x128xf32>,
    } else {
    }
    return
  }
  func.func @transform_0(%arg0: i32, %arg1: i32) -> (i32, i32, i32) {
    %c0_i32 = arith.constant 0 : i32
    %c0_i32_0 = arith.constant 0 : i32
    return %arg0, %arg1, %c0_i32 : i32, i32, i32
  }
  func.func @transform_1(%arg0: i32, %arg1: i32) -> (i32, i32) {
    %c0_i32 = arith.constant 0 : i32
    %c0_i32_0 = arith.constant 0 : i32
    %c0_i32_1 = arith.constant 0 : i32
    return %c0_i32, %c0_i32_0 : i32, i32
  }
  func.func @transform_2(%arg0: i32, %arg1: i32) -> (i32, i32) {
    %c0_i32 = arith.constant 0 : i32
    %c0_i32_0 = arith.constant 0 : i32
    %c0_i32_1 = arith.constant 0 : i32
    return %c0_i32, %c0_i32_0 : i32, i32
  }
  func.func @transform_3(%arg0: i32, %arg1: i32) -> (i32, i32) {
    %c0_i32 = arith.constant 0 : i32
    %c0_i32_0 = arith.constant 0 : i32
    return %arg0, %c0_i32 : i32, i32
  }
}

</mosaic_0001>

<bundles_post_ra>
// kernel: tpu_custom_call.1
= control target key start
LH: loop header
LB: loop body
LE: loop exit
PB: predicated region body
PF: predicated region fallthrough
CT: control target
= control target key end

     0   :  { %8 = vsyncpa [#allocation5], 0  ;;  %s732_s12 = smov 0   ;;  %s734_s13 = smov 0   ;;  %s942_s0 = inlined_call_operand.vmem [shape: f32[2,256,4], index: 0, kind: input, shape index: {}]   ;;  %s943_s1 = inlined_call_operand.vmem [shape: f32[4,128], index: 1, kind: input, shape index: {}]   ;;  %s944_s2 = inlined_call_operand.vmem [shape: f32[1,128], index: 2, kind: input, shape index: {}]   ;;  %s945_s3 = inlined_call_operand.hbm [shape: f32[2,128], index: 3, kind: output, shape index: {}]  }
   0x1   :  { %s736_s14 = smov 0   ;;  %s738_s15 = smov 0  }
   0x2   :  { %s740_s16 = smov 0  }
   0x3 LB: > { %s572_s17 = sadd.s32 4294967295, %s708_s16   ;;  %s23_s18 = sadd.s32 1, %s704_s15  ;;  %s708_s16 = sphi %s740_s16, %s14_s16   ;;  %s704_s15 = sphi %s738_s15, %s949_s15   ;;  %s700_s14 = sphi %s736_s14, %s948_s14   ;;  %s696_s13 = sphi %s734_s13, %s947_s13   ;;  %s692_s12 = sphi %s732_s12, %s946_s12  }
   0x4   : > { %p24_p0 = scmp.ge.s32.totalorder %s23_s18, 2  ;;  %p42_p1 = scmp.ne.s32.totalorder %s696_s13, %s692_s12 }
   0x5   : > { %p43_p2 = scmp.eq.s32.totalorder %s708_s16, 0  ;;  %s35_s20 = sadd.s32 1, %s696_s13 }
   0x6   : > { %s951_s18 = smov (%p24_p0, %s23_s18), 0  ;;  %p574_p5 = scmp.ge.s32.totalorder %s708_s16, 2 }
   0x7   : > { %p44_p3 = por %p43_p2, %p42_p1  ;;  %s31_s19 = ssub.s32 %s704_s15, %s951_s18 }
   0x8   : > { %p33_p4 = scmp.eq.s32.totalorder %s31_s19, 0  ;;  %142 = sbr.rel (%p574_p5) target bundleno = 49 (0x31), region = 24 }
   0xa   : > { %s768_s21 = scalar_select %p33_p4, %s696_s13, %s35_s20  }
   0xd   : > { %145 = sbr.rel (!%p44_p3) target bundleno = 49 (0x31), region = 28  ;;  %s147_s22 = sand.u32 (%p44_p3), 1, %s696_s13  }
   0xe   : > { %s588_s23 = sshll.u32 (%p44_p3), %s704_s15, 7  ;;  %s575_s24 = sshll.u32 (%p44_p3), %s147_s22, 8 }
   0xf   : > { %s776_s27 = scalar_lea.vmem (%p44_p3), %s942_s0, %s588_s23  ;;  %s781_s28 = scalar_lea.vmem (%p44_p3), [#allocation3], %s575_s24 }
  0x10   : > { %v246_v0 = vld [vmem:[%s776_s27] sm:$0xff] (%p44_p3)  ;;  %v248_v1 = vld [vmem:[%s776_s27 + $0x8] sm:$0xff] (%p44_p3)  ;;  %v250_v2 = vld [vmem:[%s776_s27 + $0x10] sm:$0xff] (%p44_p3) }
  0x11   : > { %247 = vst [vmem:[%s781_s28] sm:$0xff] (%p44_p3), %v246_v0  ;;  %v252_v3 = vld [vmem:[%s776_s27 + $0x18] sm:$0xff] (%p44_p3)  ;;  %v254_v4 = vld [vmem:[%s776_s27 + $0x20] sm:$0xff] (%p44_p3)  ;;  %v256_v5 = vld [vmem:[%s776_s27 + $0x28] sm:$0xff] (%p44_p3) }
  0x12   : > { %249 = vst [vmem:[%s781_s28 + $0x8] sm:$0xff] %v248_v1  ;;  %v258_v6 = vld [vmem:[%s776_s27 + $0x30] sm:$0xff]  ;;  %v260_v7 = vld [vmem:[%s776_s27 + $0x38] sm:$0xff]  ;;  %v262_v8 = vld [vmem:[%s776_s27 + $0x40] sm:$0xff] }
  0x13   : > { %251 = vst [vmem:[%s781_s28 + $0x10] sm:$0xff] %v250_v2  ;;  %v264_v9 = vld [vmem:[%s776_s27 + $0x48] sm:$0xff]  ;;  %v266_v10 = vld [vmem:[%s776_s27 + $0x50] sm:$0xff]  ;;  %v268_v11 = vld [vmem:[%s776_s27 + $0x58] sm:$0xff] }
  0x14   : > { %253 = vst [vmem:[%s781_s28 + $0x18] sm:$0xff] %v252_v3  ;;  %v270_v12 = vld [vmem:[%s776_s27 + $0x60] sm:$0xff]  ;;  %v272_v13 = vld [vmem:[%s776_s27 + $0x68] sm:$0xff]  ;;  %v274_v14 = vld [vmem:[%s776_s27 + $0x70] sm:$0xff] }
  0x15   : > { %255 = vst [vmem:[%s781_s28 + $0x20] sm:$0xff] %v254_v4  ;;  %v276_v15 = vld [vmem:[%s776_s27 + $0x78] sm:$0xff]  ;;  %v278_v16 = vld [vmem:[%s776_s27 + $0x100] sm:$0xff]  ;;  %v280_v17 = vld [vmem:[%s776_s27 + $0x108] sm:$0xff] }
  0x16   : > { %257 = vst [vmem:[%s781_s28 + $0x28] sm:$0xff] %v256_v5  ;;  %v282_v18 = vld [vmem:[%s776_s27 + $0x110] sm:$0xff]  ;;  %v284_v19 = vld [vmem:[%s776_s27 + $0x118] sm:$0xff]  ;;  %v286_v20 = vld [vmem:[%s776_s27 + $0x120] sm:$0xff] }
  0x17   : > { %259 = vst [vmem:[%s781_s28 + $0x30] sm:$0xff] %v258_v6  ;;  %v288_v21 = vld [vmem:[%s776_s27 + $0x128] sm:$0xff]  ;;  %v290_v22 = vld [vmem:[%s776_s27 + $0x130] sm:$0xff]  ;;  %v292_v23 = vld [vmem:[%s776_s27 + $0x138] sm:$0xff] }
  0x18   : > { %261 = vst [vmem:[%s781_s28 + $0x38] sm:$0xff] %v260_v7  ;;  %v294_v24 = vld [vmem:[%s776_s27 + $0x140] sm:$0xff]  ;;  %v296_v25 = vld [vmem:[%s776_s27 + $0x148] sm:$0xff]  ;;  %v298_v26 = vld [vmem:[%s776_s27 + $0x150] sm:$0xff] }
  0x19   : > { %263 = vst [vmem:[%s781_s28 + $0x40] sm:$0xff] %v262_v8  ;;  %v300_v27 = vld [vmem:[%s776_s27 + $0x158] sm:$0xff]  ;;  %v302_v28 = vld [vmem:[%s776_s27 + $0x160] sm:$0xff]  ;;  %v304_v29 = vld [vmem:[%s776_s27 + $0x168] sm:$0xff] }
  0x1a   : > { %265 = vst [vmem:[%s781_s28 + $0x48] sm:$0xff] %v264_v9  ;;  %v306_v30 = vld [vmem:[%s776_s27 + $0x170] sm:$0xff]  ;;  %v308_v31 = vld [vmem:[%s776_s27 + $0x178] sm:$0xff] }
  0x1b   : > { %267 = vst [vmem:[%s781_s28 + $0x50] sm:$0xff] %v266_v10 }
  0x1c   : > { %269 = vst [vmem:[%s781_s28 + $0x58] sm:$0xff] %v268_v11 }
  0x1d   : > { %271 = vst [vmem:[%s781_s28 + $0x60] sm:$0xff] %v270_v12 }
  0x1e   : > { %273 = vst [vmem:[%s781_s28 + $0x68] sm:$0xff] %v272_v13 }
  0x1f   : > { %275 = vst [vmem:[%s781_s28 + $0x70] sm:$0xff] %v274_v14 }
  0x20   : > { %277 = vst [vmem:[%s781_s28 + $0x78] sm:$0xff] %v276_v15 }
  0x21   : > { %279 = vst [vmem:[%s781_s28 + $0x80] sm:$0xff] %v278_v16 }
  0x22   : > { %281 = vst [vmem:[%s781_s28 + $0x88] sm:$0xff] %v280_v17 }
  0x23   : > { %283 = vst [vmem:[%s781_s28 + $0x90] sm:$0xff] %v282_v18 }
  0x24   : > { %285 = vst [vmem:[%s781_s28 + $0x98] sm:$0xff] %v284_v19 }
  0x25   : > { %287 = vst [vmem:[%s781_s28 + $0xa0] sm:$0xff] %v286_v20 }
  0x26   : > { %289 = vst [vmem:[%s781_s28 + $0xa8] sm:$0xff] %v288_v21 }
  0x27   : > { %291 = vst [vmem:[%s781_s28 + $0xb0] sm:$0xff] %v290_v22 }
  0x28   : > { %293 = vst [vmem:[%s781_s28 + $0xb8] sm:$0xff] %v292_v23 }
  0x29   : > { %295 = vst [vmem:[%s781_s28 + $0xc0] sm:$0xff] %v294_v24 }
  0x2a   : > { %297 = vst [vmem:[%s781_s28 + $0xc8] sm:$0xff] %v296_v25 }
  0x2b   : > { %299 = vst [vmem:[%s781_s28 + $0xd0] sm:$0xff] %v298_v26 }
  0x2c   : > { %301 = vst [vmem:[%s781_s28 + $0xd8] sm:$0xff] %v300_v27 }
  0x2d   : > { %303 = vst [vmem:[%s781_s28 + $0xe0] sm:$0xff] %v302_v28 }
  0x2e   : > { %305 = vst [vmem:[%s781_s28 + $0xe8] sm:$0xff] %v304_v29 }
  0x2f   : > { %307 = vst [vmem:[%s781_s28 + $0xf0] sm:$0xff] %v306_v30 }
  0x30   : > { %309 = vst [vmem:[%s781_s28 + $0xf8] sm:$0xff] %v308_v31 }
  0x31 PF: > { %p578_p6 = scmp.ge.s32.totalorder %s708_s16, 1  ;;  %p314_p7 = scmp.lt.s32.totalorder %s708_s16, 3 }
  0x33   : > { %p315_p8 = pnand %p578_p6, %p314_p7 }
  0x34   : > { %s321_s29 = sand.u32 (!%p315_p8), 1, %s692_s12   ;;  %p580_p9 = scmp.ne.s32.totalorder (!%p315_p8), %s700_s14, 0 }
  0x35   : > { %318 = sbr.rel (%p315_p8) target bundleno = 259 (0x103), region = 66  ;;  %s579_s30 = sshll.u32 (!%p315_p8), %s321_s29, 8 }
  0x36   : > { %s847_s4 = scalar_lea.vmem (!%p315_p8), [#allocation3], %s579_s30 }
  0x3a   : > { %344 = sbr.rel (%p580_p9) target bundleno = 65 (0x41), region = 74 }
  0x3f   : > { %vm345_vm0 = vcmask 25600   ;;  %v710_v32 = vmov 0.0  }
  0x40   : > { %346 = vst.msk [vmem:[#allocation2] sm:$0x3] %vm345_vm0, %v710_v32 }
  0x41 PF: > { %v348_v33 = vld [vmem:[%s847_s4] sm:$0xff]  ;;  %v349_v34 = vld [vmem:[%s847_s4 + $0x8] sm:$0xff]  ;;  %vm380_vm1 = vcmask 31744   ;;  %v350_v35 = vld [vmem:[%s847_s4 + $0x10] sm:$0xff]  ;;  %vm457_vm2 = vcmask 1041409   ;;  %vm461_vm3 = vcmask 25600  }
  0x42   : > { %v351_v36 = vld [vmem:[%s847_s4 + $0x18] sm:$0xff]  ;;  %v381_v37 = vsel %vm380_vm1, %v348_v33, 0.0  ;;  %v382_v38 = vsel %vm380_vm1, %v349_v34, 0.0  ;;  %v352_v39 = vld [vmem:[%s847_s4 + $0x20] sm:$0xff]  ;;  %v384_v41 = vsel %vm380_vm1, %v350_v35, 0.0  ;;  %v353_v43 = vld [vmem:[%s847_s4 + $0x28] sm:$0xff] }
  0x43   : > { %v383_v40 = vadd.f32 %v382_v38, %v381_v37  ;;  %v386_v42 = vsel %vm380_vm1, %v351_v36, 0.0  ;;  %v354_v45 = vld [vmem:[%s847_s4 + $0x30] sm:$0xff]  ;;  %v364_v46 = vld [vmem:[%s847_s4 + $0x80] sm:$0xff]  ;;  %v388_v47 = vsel %vm380_vm1, %v352_v39, 0.0  ;;  %v365_v48 = vld [vmem:[%s847_s4 + $0x88] sm:$0xff]  ;;  %v390_v53 = vsel %vm380_vm1, %v353_v43, 0.0 }
  0x44   : > { %v366_v49 = vld [vmem:[%s847_s4 + $0x90] sm:$0xff]  ;;  %v367_v50 = vld [vmem:[%s847_s4 + $0x98] sm:$0xff]  ;;  %v418_v52 = vsel %vm380_vm1, %v364_v46, 0.0  ;;  %v419_v54 = vsel %vm380_vm1, %v365_v48, 0.0  ;;  %v368_v57 = vld [vmem:[%s847_s4 + $0xa0] sm:$0xff]  ;;  %v392_v60 = vsel %vm380_vm1, %v354_v45, 0.0 }
  0x45   : > { %v385_v44 = vadd.f32 %v384_v41, %v383_v40  ;;  %v421_v55 = vsel %vm380_vm1, %v366_v49, 0.0  ;;  %v355_v56 = vld [vmem:[%s847_s4 + $0x38] sm:$0xff]  ;;  %v420_v59 = vadd.f32 %v419_v54, %v418_v52  ;;  %v423_v61 = vsel %vm380_vm1, %v367_v50, 0.0  ;;  %v356_v62 = vld [vmem:[%s847_s4 + $0x40] sm:$0xff]  ;;  %v369_v63 = vld [vmem:[%s847_s4 + $0xa8] sm:$0xff]  ;;  %p581_p10 = scmp.ne.s32.totalorder %s700_s14, 1 }
  0x46   : > { %v394_v2 = vsel %vm380_vm1, %v355_v56, 0.0  ;;  %v425_v3 = vsel %vm380_vm1, %v368_v57, 0.0  ;;  %v357_v4 = vld [vmem:[%s847_s4 + $0x48] sm:$0xff]  ;;  %v370_v5 = vld [vmem:[%s847_s4 + $0xb0] sm:$0xff]  ;;  %v396_v8 = vsel %vm380_vm1, %v356_v62, 0.0  ;;  %v427_v9 = vsel %vm380_vm1, %v369_v63, 0.0 }
  0x47   : > { %v387_v51 = vadd.f32 %v386_v42, %v385_v44  ;;  %v422_v1 = vadd.f32 %v421_v55, %v420_v59  ;;  %v358_v10 = vld [vmem:[%s847_s4 + $0x50] sm:$0xff]  ;;  %v371_v11 = vld [vmem:[%s847_s4 + $0xb8] sm:$0xff]  ;;  %v398_v14 = vsel %vm380_vm1, %v357_v4, 0.0  ;;  %v429_v15 = vsel %vm380_vm1, %v370_v5, 0.0  ;;  %v372_v17 = vld [vmem:[%s847_s4 + $0xc0] sm:$0xff] }
  0x48   : > { %v359_v16 = vld [vmem:[%s847_s4 + $0x58] sm:$0xff]  ;;  %v400_v20 = vsel %vm380_vm1, %v358_v10, 0.0  ;;  %v431_v21 = vsel %vm380_vm1, %v371_v11, 0.0  ;;  %v360_v22 = vld [vmem:[%s847_s4 + $0x60] sm:$0xff]  ;;  %v373_v23 = vld [vmem:[%s847_s4 + $0xc8] sm:$0xff]  ;;  %v433_v27 = vsel %vm380_vm1, %v372_v17, 0.0 }
  0x49   : > { %v389_v58 = vadd.f32 %v388_v47, %v387_v51  ;;  %v424_v7 = vadd.f32 %v423_v61, %v422_v1  ;;  %v402_v26 = vsel %vm380_vm1, %v359_v16, 0.0  ;;  %v361_v28 = vld [vmem:[%s847_s4 + $0x68] sm:$0xff]  ;;  %v374_v29 = vld [vmem:[%s847_s4 + $0xd0] sm:$0xff]  ;;  %v404_v32 = vsel %vm380_vm1, %v360_v22, 0.0  ;;  %v375_v35 = vld [vmem:[%s847_s4 + $0xd8] sm:$0xff] }
  0x4a   : > { %v435_v33 = vsel %vm380_vm1, %v373_v23, 0.0  ;;  %v362_v34 = vld [vmem:[%s847_s4 + $0x70] sm:$0xff]  ;;  %v406_v38 = vsel %vm380_vm1, %v361_v28, 0.0  ;;  %v437_v39 = vsel %vm380_vm1, %v374_v29, 0.0  ;;  %v363_v40 = vld [vmem:[%s847_s4 + $0x78] sm:$0xff]  ;;  %v376_v41 = vld [vmem:[%s847_s4 + $0xe0] sm:$0xff] }
  0x4b   : > { %v391_v0 = vadd.f32 %v390_v53, %v389_v58  ;;  %v426_v13 = vadd.f32 %v425_v3, %v424_v7  ;;  %v408_v44 = vsel %vm380_vm1, %v362_v34, 0.0  ;;  %v439_v45 = vsel %vm380_vm1, %v375_v35, 0.0  ;;  %v377_v46 = vld [vmem:[%s847_s4 + $0xe8] sm:$0xff]  ;;  %v378_v51 = vld [vmem:[%s847_s4 + $0xf0] sm:$0xff]  ;;  %v379_v55 = vld [vmem:[%s847_s4 + $0xf8] sm:$0xff] }
  0x4c   : > { %v410_v49 = vsel %vm380_vm1, %v363_v40, 0.0  ;;  %v441_v50 = vsel %vm380_vm1, %v376_v41, 0.0  ;;  %v443_v54 = vsel %vm380_vm1, %v377_v46, 0.0  ;;  %v445_v58 = vsel %vm380_vm1, %v378_v51, 0.0  ;;  %v347_v10 = vld [vmem:[#allocation2] sm:$0x3] }
  0x4d   : > { %v393_v6 = vadd.f32 %v392_v60, %v391_v0  ;;  %v428_v19 = vadd.f32 %v427_v9, %v426_v13  ;;  %v447_v61 = vsel %vm380_vm1, %v379_v55, 0.0 }
  0x4f   : > { %v395_v12 = vadd.f32 %v394_v2, %v393_v6  ;;  %v430_v25 = vadd.f32 %v429_v15, %v428_v19 }
  0x51   : > { %v397_v18 = vadd.f32 %v396_v8, %v395_v12  ;;  %v432_v31 = vadd.f32 %v431_v21, %v430_v25 }
  0x53   : > { %v399_v24 = vadd.f32 %v398_v14, %v397_v18  ;;  %v434_v37 = vadd.f32 %v433_v27, %v432_v31 }
  0x55   : > { %v401_v30 = vadd.f32 %v400_v20, %v399_v24  ;;  %v436_v43 = vadd.f32 %v435_v33, %v434_v37 }
  0x57   : > { %v403_v36 = vadd.f32 %v402_v26, %v401_v30  ;;  %v438_v48 = vadd.f32 %v437_v39, %v436_v43 }
  0x59   : > { %v405_v42 = vadd.f32 %v404_v32, %v403_v36  ;;  %v440_v53 = vadd.f32 %v439_v45, %v438_v48 }
  0x5b   : > { %v407_v47 = vadd.f32 %v406_v38, %v405_v42  ;;  %v442_v57 = vadd.f32 %v441_v50, %v440_v53 }
  0x5d   : > { %v409_v52 = vadd.f32 %v408_v44, %v407_v47  ;;  %v444_v60 = vadd.f32 %v443_v54, %v442_v57 }
  0x5f   : > { %v411_v56 = vadd.f32 %v410_v49, %v409_v52  ;;  %v446_v63 = vadd.f32 %v445_v58, %v444_v60 }
  0x61   : > { %v412_v59 = vrot.slane %v411_v56, 4  ;;  %v448_v1 = vadd.f32 %v447_v61, %v446_v63 }
  0x63   : > { %v413_v62 = vadd.f32 %v412_v59, %v411_v56  ;;  %v449_v3 = vrot.slane %v448_v1, 4 }
  0x65   : > { %v414_v0 = vrot.slane %v413_v62, 2  ;;  %v450_v4 = vadd.f32 %v449_v3, %v448_v1 }
  0x67   : > { %v415_v2 = vadd.f32 %v414_v0, %v413_v62  ;;  %v451_v6 = vrot.slane %v450_v4, 2 }
  0x69   : > { %v416_v5 = vrot.slane %v415_v2, 1  ;;  %v452_v7 = vadd.f32 %v451_v6, %v450_v4 }
  0x6b   : > { %v417_v8 = vadd.f32 %v416_v5, %v415_v2  ;;  %v453_v9 = vrot.slane %v452_v7, 1 }
  0x6d   : > { %v454_v11 = vadd.f32 %v453_v9, %v452_v7 }
  0x6e   : > { %466 = sbr.rel (%p581_p10) target bundleno = 253 (0xfd), region = 78 }
  0x6f   : > { %v458_v12 = vsel %vm457_vm2, %v454_v11, %v417_v8 }
  0x70   : > { %v460_v13 = vadd.f32 %v458_v12, %v347_v10 }
  0x72   : > { %462 = vst.msk [vmem:[#allocation2] sm:$0x3] %vm461_vm3, %v460_v13 }
  0x73   : > { %v469_v14 = vld [vmem:[%s943_s1] sm:$0xf]  ;;  %vm477_vm4 = vcmask 1043456  }
  0x74   : > { %582 = vmatpush.msk.msra.mxu0 %vm477_vm4, %v469_v14  ;;  %v637_v17 = vld [vmem:[%s944_s2] ss:$0 sm:$0xff] }
  0x79   : > { %v467_v15 = vld [vmem:[#allocation2] sm:$0x3] }
  0x7a   : > { %v468_v16 = vmul.f32 0.00390625, %v467_v15 }
  0x7c   : > { %583 = vmatmul.msk.f32.vlgmr.msra.gmra.mxu0 %vm380_vm1, %v468_v16 }
  0xf9   : > { %v498_v18 = vpop.f32.mrf.mxu0 }
  0xfa   : > { %v499_v19 = vadd.f32 %v637_v17, %v498_v18 }
  0xfc   : > { %501 = vst [vmem:[#allocation4] sm:$0x3] %v499_v19 }
  0xfd PF: > { %p593_p11 = scmp.eq.s32.totalorder %s572_s17, 1  ;;  %s512_s11 = sshll.u32 %s945_s3, 4  ;;  %s513_s11 = int_to_ptr.hbm [resolvable:$true] %s512_s11 }
  0xfe   : > { %s711_s12 = smov [#allocation4]  }
  0xff   : > { %s510_s14 = sshll.u32 %s711_s12, 4  ;;  %s511_s14 = int_to_ptr.vmem [resolvable:$true] %s510_s14 }
 0x100   : > { %590 = dma.vmem_to_hbm [thread:$0]  (%p593_p11), %s511_s14, 32, %s513_s11, [#allocation5]  }
 0x101   : > { %687 = dma.done.wait (%p593_p11), [#allocation5], 32  }
 0x102   : > { %689 = vsyncadd (%p593_p11), [#allocation5], 4294967264 }
 0x103 PF: > { %s14_s16 = sadd.s32 1, %s708_s16   ;;  %s946_s12 = smov %s696_s13 }
 0x104   : > { %p11_p12 = scmp.ge.s32.totalorder %s14_s16, 4   ;;  %s947_s13 = smov %s768_s21 }
 0x105   : > { %s948_s14 = smov %s704_s15  ;;  %s949_s15 = smov %s951_s18 }
 0x106   :  { %13 = sbr.rel (!%p11_p12) target bundleno = 3 (0x3), region = 111 }
 0x10b   :  { %526 = vsyncpa [#allocation5], 1 }
 0x10c   :  { %528 = vsyncpa [#allocation5 + $0x1], 1 }

</bundles_post_ra>
